<compile_context>
chip_gen: v5e
topology: v5e:2x2
jax: 0.10.0
libtpu: 0.0.40
codegen_flags: <defaults>
</compile_context>

<pallas_src>
import functools
import inspect
from typing import NamedTuple

import jax
import jax.numpy as jnp
from jax.experimental import pallas as pl
from jax.experimental.pallas import tpu as pltpu


def _round_up(a: int, b: int) -> int:
    return (a + b - 1) // b * b


def _cdiv(a: int, b: int) -> int:
    return (a + b - 1) // b


# -----------------------------------------------------------------------------
# Hardware detection / capability checks
# -----------------------------------------------------------------------------
class _HW(NamedTuple):
    name: str
    vmem_bytes: int        # physical VMEM per TensorCore
    mxu: int               # MXU column width (128 or 256)
    num_cores: int         # TensorCores sharing the grid ("parallel" axes)
    bf16_vpu: bool         # VPU has a native bf16 path
    default_block_m: int   # default row-tile target


def _detect_hw() -> _HW:
    devices = jax.devices()
    kind = (getattr(devices[0], "device_kind", "") or "").lower() if devices else ""
    if "v7" in kind or "tpu7" in kind:
        hw = _HW("v7x", 64 << 20, 256, 2, True, 512)
    elif "v6" in kind:
        hw = _HW("v6e", 128 << 20, 256, 1, True, 1024)
    elif "v5" in kind and ("lite" in kind or "v5e" in kind):
        hw = _HW("v5e", 128 << 20, 128, 1, False, 1024)
    else:  # v4 / v5p / unknown: conservative 128-wide-MXU, f32-VPU defaults
        hw = _HW("tpu", 128 << 20, 128, 1, False, 1024)
    # Refine VMEM capacity from the runtime when available.  This is a narrow
    # capability probe (it never masks kernel compile/runtime errors).
    if hasattr(pltpu, "get_tpu_info"):
        try:
            cap = int(getattr(pltpu.get_tpu_info(), "vmem_capacity_bytes", 0) or 0)
            if cap > 0:
                hw = hw._replace(vmem_bytes=cap)
        except Exception:
            pass
    return hw


def _supports_single_buffering() -> bool:
    """Explicit capability check for BlockSpec(pipeline_mode=pl.Buffered(1))."""
    if not hasattr(pl, "Buffered"):
        return False
    try:
        sig = inspect.signature(pl.BlockSpec)
    except (TypeError, ValueError):
        return False
    return "pipeline_mode" in sig.parameters


# -----------------------------------------------------------------------------
# Kernels
# -----------------------------------------------------------------------------
def _ff_kernel_resident(x_ref, w1_ref, b1_ref, w2_ref, b2_ref, o_ref, *, act_dtype):
    """num_h == 1: weights resident in VMEM, write the output tile directly."""
    # First matmul on the MXU, f32 accumulation.
    h = jnp.dot(x_ref[...], w1_ref[...], preferred_element_type=jnp.float32)
    # Bias add + ReLU on the VPU (bf16 on v6e/v7x, f32 on v5e).
    h = jnp.maximum(h.astype(act_dtype) + b1_ref[...].astype(act_dtype), 0.0)
    # Second matmul: MXU in the weight dtype, f32 accumulation.
    out = jnp.dot(h.astype(w2_ref.dtype), w2_ref[...],
                  preferred_element_type=jnp.float32)
    o_ref[...] = (out + b2_ref[...]).astype(o_ref.dtype)


def _ff_kernel_tiled(x_ref, w1_ref, b1_ref, w2_ref, b2_ref, o_ref, acc_ref, *, act_dtype):
    """num_h > 1: accumulate partial products over the H (reduction) grid axis."""
    h_id = pl.program_id(1)

    @pl.when(h_id == 0)
    def _init():
        acc_ref[...] = jnp.zeros_like(acc_ref)

    h = jnp.dot(x_ref[...], w1_ref[...], preferred_element_type=jnp.float32)
    h = jnp.maximum(h.astype(act_dtype) + b1_ref[...].astype(act_dtype), 0.0)
    acc_ref[...] += jnp.dot(h.astype(w2_ref.dtype), w2_ref[...],
                            preferred_element_type=jnp.float32)

    @pl.when(h_id == pl.num_programs(1) - 1)
    def _finalize():
        o_ref[...] = (acc_ref[...] + b2_ref[...]).astype(o_ref.dtype)


# -----------------------------------------------------------------------------
# Tiling / VMEM-budget configuration (computed once per weight set)
# -----------------------------------------------------------------------------
class _Config(NamedTuple):
    E_pad: int
    H_pad: int
    th: int
    tm_max: int
    sub_align: int
    single_buffer: bool
    vmem_limit: int


def _choose_config(E, H, c_it, o_it, hw, sub_align) -> _Config:
    e_align = 256 if (hw.mxu >= 256 and E >= 256) else 128
    h_align = 256 if (hw.mxu >= 256 and H >= 256) else 128
    E_pad = _round_up(E, e_align)
    budget = int(hw.vmem_bytes * 0.85)   # headroom for compiler scratch/semaphores
    tm_max = max(_round_up(hw.default_block_m, sub_align), sub_align)

    def footprint(tm, th, w_bufs, with_acc):
        fp = 2 * tm * E_pad * c_it            # x tiles (double-buffered)
        fp += 2 * tm * E_pad * o_it           # out tiles (double-buffered)
        fp += w_bufs * 2 * E_pad * th * c_it  # W1 + W2 blocks
        fp += w_bufs * (th + E_pad) * 4       # f32 biases
        fp += tm * th * 4                     # hidden intermediate (f32)
        if with_acc:
            fp += tm * E_pad * 4              # f32 accumulator scratch
        return fp

    H_res = _round_up(H, h_align)
    # Preferred: weights resident across all row tiles (num_h == 1).
    if footprint(tm_max, H_res, 2, False) <= budget:
        return _Config(E_pad, H_res, H_res, tm_max, sub_align, False, budget)
    if _supports_single_buffering() and footprint(tm_max, H_res, 1, False) <= budget:
        return _Config(E_pad, H_res, H_res, tm_max, sub_align, True, budget)

    # Otherwise tile the hidden (reduction) axis: shrink th, then tm if needed.
    tm = tm_max
    while True:
        th = H_res
        while th > h_align and footprint(tm, th, 2, True) > budget:
            th = max(h_align, _round_up(th // 2, h_align))
        if footprint(tm, th, 2, True) <= budget or tm <= sub_align:
            break
        tm = max(sub_align, _round_up(tm // 2, sub_align))
    H_pad = _round_up(H, th)
    return _Config(E_pad, H_pad, th, tm, sub_align, False, budget)


# -----------------------------------------------------------------------------
# Public API
# -----------------------------------------------------------------------------
def make_feed_forward(w1, b1, w2, b2, *, compute_dtype=jnp.bfloat16,
                      out_dtype=None, hw=None):
    """Build `apply(x) -> relu(x @ w1 + b1) @ w2 + b2`.

    w1: [E, H], b1: [H], w2: [H, E], b2: [E]  (nn.Linear weights transposed to
    [in, out]).  Weights are zero-padded to lane-dense shapes and cast to the
    compute dtype exactly once here; every forward only pads/casts activations.
    Zero padding is mathematically inert (ReLU(0)=0, zero rows/cols add 0).
    Note: compute_dtype=bf16 trades bit-parity with the f32 PyTorch forward for
    MXU throughput; use compute_dtype=jnp.float32 for exact parity.
    """
    hw = hw if hw is not None else _detect_hw()
    E, H = int(w1.shape[0]), int(w1.shape[1])
    assert w2.shape == (H, E) and b1.shape == (H,) and b2.shape == (E,)

    cdt = jnp.dtype(compute_dtype)
    sub_align = 16 if cdt.itemsize == 2 else (32 if cdt.itemsize == 1 else 8)
    # Output itemsize only known per call; budget conservatively for f32 out.
    cfg = _choose_config(E, H, cdt.itemsize, 4, hw, sub_align)
    E_pad, H_pad = cfg.E_pad, cfg.H_pad
    num_h = H_pad // cfg.th

    # Bias-add + ReLU dtype: bf16 where the VPU supports it, else f32 (v5e).
    act_dtype = cdt if (hw.bf16_vpu and cdt.itemsize == 2) else jnp.float32

    # One-time weight padding + cast (previously paid on every forward call).
    w1p = jnp.pad(jnp.asarray(w1, cdt), ((0, E_pad - E), (0, H_pad - H)))
    w2p = jnp.pad(jnp.asarray(w2, cdt), ((0, H_pad - H), (0, E_pad - E)))
    b1p = jnp.pad(jnp.asarray(b1, jnp.float32), (0, H_pad - H)).reshape(1, H_pad)
    b2p = jnp.pad(jnp.asarray(b2, jnp.float32), (0, E_pad - E)).reshape(1, E_pad)

    @jax.jit
    def _apply(x, w1p, b1p, w2p, b2p):
        orig_shape = x.shape
        assert orig_shape[-1] == E, "last dim of x must equal embedding_dim"
        odt = jnp.dtype(out_dtype) if out_dtype is not None else jnp.dtype(x.dtype)

        x2d = x.reshape(-1, E)
        M = x2d.shape[0]

        # Row tile: capped by the config, multiple of the sublane alignment;
        # on multi-TensorCore chips (v7x) split so num_m >= 2 when M allows so
        # the "parallel" m axis shards across both cores.
        tm = min(cfg.tm_max, _round_up(M, cfg.sub_align))
        if hw.num_cores >= 2:
            tm = min(tm, max(cfg.sub_align, _round_up(_cdiv(M, 2), cfg.sub_align)))
        M_pad = _round_up(M, tm)
        num_m = M_pad // tm

        xc = x2d.astype(cdt)
        if M_pad != M or E_pad != E:
            xc = jnp.pad(xc, ((0, M_pad - M), (0, E_pad - E)))

        weight_reads = 1 if num_h == 1 else num_m   # re-streamed per m tile if tiled
        cost = pl.CostEstimate(
            flops=int(4 * M_pad * E_pad * H_pad),
            transcendentals=0,
            bytes_accessed=int(
                M_pad * E_pad * (cdt.itemsize + odt.itemsize)
                + weight_reads * 2 * E_pad * H_pad * cdt.itemsize
                + (H_pad + E_pad) * 4),
        )

        if num_h == 1:
            # Resident-weights path: constant index_maps => weights DMA'd once
            # and kept in VMEM across all m tiles; no accumulator scratch.
            pm = {"pipeline_mode": pl.Buffered(1)} if cfg.single_buffer else {}
            in_specs = [
                pl.BlockSpec((tm, E_pad), lambda i: (i, 0)),
                pl.BlockSpec((E_pad, H_pad), lambda i: (0, 0), **pm),
                pl.BlockSpec((1, H_pad), lambda i: (0, 0), **pm),
                pl.BlockSpec((H_pad, E_pad), lambda i: (0, 0), **pm),
                pl.BlockSpec((1, E_pad), lambda i: (0, 0), **pm),
            ]
            out_spec = pl.BlockSpec((tm, E_pad), lambda i: (i, 0))
            grid = (num_m,)
            scratch = []
            dims = ("parallel",)
            kernel = functools.partial(_ff_kernel_resident, act_dtype=act_dtype)
        else:
            th = cfg.th
            in_specs = [
                pl.BlockSpec((tm, E_pad), lambda i, h: (i, 0)),
                pl.BlockSpec((E_pad, th), lambda i, h: (0, h)),
                pl.BlockSpec((1, th), lambda i, h: (0, h)),
                pl.BlockSpec((th, E_pad), lambda i, h: (h, 0)),
                pl.BlockSpec((1, E_pad), lambda i, h: (0, 0)),
            ]
            out_spec = pl.BlockSpec((tm, E_pad), lambda i, h: (i, 0))
            grid = (num_m, num_h)
            scratch = [pltpu.VMEM((tm, E_pad), jnp.float32)]
            dims = ("parallel", "arbitrary")
            kernel = functools.partial(_ff_kernel_tiled, act_dtype=act_dtype)

        out = pl.pallas_call(
            kernel,
            out_shape=jax.ShapeDtypeStruct((M_pad, E_pad), odt),
            grid_spec=pltpu.PrefetchScalarGridSpec(
                num_scalar_prefetch=0,
                grid=grid,
                in_specs=in_specs,
                out_specs=out_spec,
                scratch_shapes=scratch,
            ),
            compiler_params=pltpu.CompilerParams(
                dimension_semantics=dims,
                vmem_limit_bytes=int(cfg.vmem_limit)),
            cost_estimate=cost,
        )(xc, w1p, b1p, w2p, b2p)

        if M_pad != M or E_pad != E:
            out = out[:M, :E]
        return out.reshape(orig_shape)

    def apply(x):
        return _apply(x, w1p, b1p, w2p, b2p)

    return apply


def feed_forward(x, w1, b1, w2, b2, *, compute_dtype=jnp.bfloat16, out_dtype=None):
    """One-shot convenience wrapper.  NOTE: re-pads/casts the weights on every
    call -- prefer make_feed_forward() and reuse the returned apply()."""
    return make_feed_forward(w1, b1, w2, b2, compute_dtype=compute_dtype,
                             out_dtype=out_dtype)(x)


def _reference(x2d, w1, b1, w2, b2):
    h = jnp.maximum(x2d @ w1 + b1, 0.0)
    return h @ w2 + b2


if __name__ == "__main__":
    # ModelParams from rl4mixed graph_encoder: embedding_dim=32, ff_hidden=64.
    B, S, E, H = 2, 8, 32, 64
    key = jax.random.PRNGKey(0)
    kx, k1, kb1, k2, kb2 = jax.random.split(key, 5)

    x = jax.random.normal(kx, (B, S, E), dtype=jnp.float32)

    # nn.Linear stores weights as (out, in); transpose to the kernel's
    # [in, out] layout.  Deterministic synthetic init.
    w1 = (jax.random.normal(k1, (H, E), dtype=jnp.float32) * (1.0 / E ** 0.5)).T
    b1 = jax.random.normal(kb1, (H,), dtype=jnp.float32) * 0.01
    w2 = (jax.random.normal(k2, (E, H), dtype=jnp.float32) * (1.0 / H ** 0.5)).T
    b2 = jax.random.normal(kb2, (E,), dtype=jnp.float32) * 0.01

    ref = _reference(x.reshape(-1, E), w1, b1, w2, b2).reshape(B, S, E)

    # Exact-precision path (f32 MXU inputs) -- matches the PyTorch forward.
    ff_f32 = make_feed_forward(w1, b1, w2, b2, compute_dtype=jnp.float32)
    out_f32 = jax.block_until_ready(ff_f32(x))
    assert out_f32.shape == (B, S, E)
    assert jnp.allclose(out_f32, ref, atol=1e-4, rtol=1e-4), "f32 mismatch"

    # Fast path: bf16 MXU inputs, f32 accumulation.  Weights are padded/cast
    # once at construction; the second call reuses them and the jit cache.
    ff_bf16 = make_feed_forward(w1, b1, w2, b2, compute_dtype=jnp.bfloat16)
    out_bf16 = jax.block_until_ready(ff_bf16(x))
    out_bf16 = jax.block_until_ready(ff_bf16(x))
    assert out_bf16.shape == (B, S, E)
    assert out_bf16.dtype == x.dtype
    assert jnp.allclose(out_bf16, ref, atol=5e-2, rtol=5e-2), "bf16 mismatch"

    print("KERNEL_OK")
</pallas_src>

<mosaic_0001>
module attributes {stable_mosaic.version = 11 : i64} {
  func.func @_ff_kernel_resident(%arg0: i32, %arg1: memref<16x128xf32, #tpu.memory_space<vmem>>, %arg2: memref<128x128xf32, #tpu.memory_space<vmem>>, %arg3: memref<1x128xf32, #tpu.memory_space<vmem>>, %arg4: memref<128x128xf32, #tpu.memory_space<vmem>>, %arg5: memref<1x128xf32, #tpu.memory_space<vmem>>, %arg6: memref<16x128xf32, #tpu.memory_space<vmem>>) attributes {dimension_semantics = [#tpu.dimension_semantics<parallel>], iteration_bounds = array<i64: 1>, scalar_prefetch = 0 : i64, scratch_operands = 0 : i64, tpu.core_type = #tpu.core_type<tc>, window_params = [{transform_indices = @transform_0, window_bounds = array<i64: 16, 128>}, {pipeline_mode = #tpu.pipeline_mode<synchronous>, transform_indices = @transform_1, window_bounds = array<i64: 128, 128>}, {pipeline_mode = #tpu.pipeline_mode<synchronous>, transform_indices = @transform_2, window_bounds = array<i64: 1, 128>}, {pipeline_mode = #tpu.pipeline_mode<synchronous>, transform_indices = @transform_3, window_bounds = array<i64: 128, 128>}, {pipeline_mode = #tpu.pipeline_mode<synchronous>, transform_indices = @transform_4, window_bounds = array<i64: 1, 128>}, {transform_indices = @transform_5, window_bounds = array<i64: 16, 128>}]} {
    %c0 = arith.constant 0 : index
    %c0_0 = arith.constant 0 : index
    %0 = vector.load %arg1[%c0, %c0_0] : memref<16x128xf32, #tpu.memory_space<vmem>>, vector<16x128xf32>
    %c0_1 = arith.constant 0 : index
    %c0_2 = arith.constant 0 : index
    %1 = vector.load %arg2[%c0_1, %c0_2] : memref<128x128xf32, #tpu.memory_space<vmem>>, vector<128x128xf32>
    %cst = arith.constant dense<0.000000e+00> : vector<16x128xf32>
    %2 = tpu.matmul %0, %1, %cst {dimension_numbers = #tpu.dot_dimension_numbers<[1], [0], [0], [1], [0, 0, 1, 1], [], []>} : vector<16x128xf32>, vector<128x128xf32>, vector<16x128xf32> -> vector<16x128xf32>
    %c0_3 = arith.constant 0 : index
    %c0_4 = arith.constant 0 : index
    %3 = vector.load %arg3[%c0_3, %c0_4] : memref<1x128xf32, #tpu.memory_space<vmem>>, vector<1x128xf32>
    %4 = vector.broadcast %3 : vector<1x128xf32> to vector<16x128xf32>
    %5 = arith.addf %2, %4 : vector<16x128xf32>
    %cst_5 = arith.constant 0.000000e+00 : f32
    %6 = vector.broadcast %cst_5 : f32 to vector<16x128xf32>
    %7 = arith.maximumf %5, %6 : vector<16x128xf32>
    %c0_6 = arith.constant 0 : index
    %c0_7 = arith.constant 0 : index
    %8 = vector.load %arg4[%c0_6, %c0_7] : memref<128x128xf32, #tpu.memory_space<vmem>>, vector<128x128xf32>
    %cst_8 = arith.constant dense<0.000000e+00> : vector<16x128xf32>
    %9 = tpu.matmul %7, %8, %cst_8 {dimension_numbers = #tpu.dot_dimension_numbers<[1], [0], [0], [1], [0, 0, 1, 1], [], []>} : vector<16x128xf32>, vector<128x128xf32>, vector<16x128xf32> -> vector<16x128xf32>
    %c0_9 = arith.constant 0 : index
    %c0_10 = arith.constant 0 : index
    %10 = vector.load %arg5[%c0_9, %c0_10] : memref<1x128xf32, #tpu.memory_space<vmem>>, vector<1x128xf32>
    %11 = vector.broadcast %10 : vector<1x128xf32> to vector<16x128xf32>
    %12 = arith.addf %9, %11 : vector<16x128xf32>
    %c0_11 = arith.constant 0 : index
    %c0_12 = arith.constant 0 : index
    %13 = vector.load %arg6[%c0_11, %c0_12] : memref<16x128xf32, #tpu.memory_space<vmem>>, vector<16x128xf32>
    tpu.vector_store %arg6[%c0_11, %c0_12], %12 {strides = array<i32>} : memref<16x128xf32, #tpu.memory_space<vmem>>, vector<16x128xf32>,
    return
  }
  func.func @transform_0(%arg0: i32) -> (i32, i32) {
    %c0_i32 = arith.constant 0 : i32
    %c0_i32_0 = arith.constant 0 : i32
    return %arg0, %c0_i32 : i32, i32
  }
  func.func @transform_1(%arg0: i32) -> (i32, i32) {
    %c0_i32 = arith.constant 0 : i32
    %c0_i32_0 = arith.constant 0 : i32
    %c0_i32_1 = arith.constant 0 : i32
    return %c0_i32, %c0_i32_0 : i32, i32
  }
  func.func @transform_2(%arg0: i32) -> (i32, i32) {
    %c0_i32 = arith.constant 0 : i32
    %c0_i32_0 = arith.constant 0 : i32
    %c0_i32_1 = arith.constant 0 : i32
    return %c0_i32, %c0_i32_0 : i32, i32
  }
  func.func @transform_3(%arg0: i32) -> (i32, i32) {
    %c0_i32 = arith.constant 0 : i32
    %c0_i32_0 = arith.constant 0 : i32
    %c0_i32_1 = arith.constant 0 : i32
    return %c0_i32, %c0_i32_0 : i32, i32
  }
  func.func @transform_4(%arg0: i32) -> (i32, i32) {
    %c0_i32 = arith.constant 0 : i32
    %c0_i32_0 = arith.constant 0 : i32
    %c0_i32_1 = arith.constant 0 : i32
    return %c0_i32, %c0_i32_0 : i32, i32
  }
  func.func @transform_5(%arg0: i32) -> (i32, i32) {
    %c0_i32 = arith.constant 0 : i32
    %c0_i32_0 = arith.constant 0 : i32
    return %arg0, %c0_i32 : i32, i32
  }
}

</mosaic_0001>

<bundles_post_ra>
// kernel: _apply.1
= control target key start
LH: loop header
LB: loop body
LE: loop exit
PB: predicated region body
PF: predicated region fallthrough
CT: control target
= control target key end

     0   :  { %10 = vsyncpa [#allocation3], 0  ;;  %s298_s0 = inlined_call_operand.vmem [shape: f32[16,128], index: 0, kind: input, shape index: {}]   ;;  %s299_s1 = inlined_call_operand.hbm [shape: f32[128,128], index: 1, kind: input, shape index: {}]   ;;  %s300_s2 = inlined_call_operand.vmem [shape: f32[1,128], index: 2, kind: input, shape index: {}]   ;;  %s301_s3 = inlined_call_operand.hbm [shape: f32[128,128], index: 3, kind: input, shape index: {}]   ;;  %s302_s4 = inlined_call_operand.vmem [shape: f32[1,128], index: 4, kind: input, shape index: {}]   ;;  %s303_s5 = inlined_call_operand.vmem [shape: f32[16,128], index: 5, kind: output, shape index: {}]  }
   0x1   :  { %s18_s20 = sshll.u32 %s299_s1, 4  ;;  %s19_s20 = int_to_ptr.hbm [resolvable:$true] %s18_s20 }
   0x2   :  { %11 = vsyncpa [#allocation5], 0  ;;  %s240_s21 = smov [#allocation2]   ;;  %s33_s25 = sshll.u32 %s301_s3, 4  ;;  %s34_s25 = int_to_ptr.hbm [resolvable:$true] %s33_s25 }
   0x3   :  { %s20_s22 = sshll.u32 %s240_s21, 4  ;;  %s241_s26 = smov 128   ;;  %s21_s22 = int_to_ptr.vmem [resolvable:$true] %s20_s22 }
   0x4   :  { %s242_s27 = smov 8   ;;  %s243_s28 = smov [#allocation4]  }
   0x5   :  { %26 = dma.hbm_to_vmem [thread:$0]  %s19_s20, 2048, %s21_s22, [#allocation3], %s241_s26, %s241_s26, %s242_s27  }
   0x6   :  { %s35_s29 = sshll.u32 %s243_s28, 4  ;;  %s36_s29 = int_to_ptr.vmem [resolvable:$true] %s35_s29 }
   0x7   :  { %41 = dma.hbm_to_vmem [thread:$0]  %s34_s25, 2048, %s36_s29, [#allocation5], %s241_s26, %s241_s26, %s242_s27  }
   0x8   :  { %236 = dma.done.wait [#allocation3], 2048  }
   0x9   :  { %237 = vsyncadd [#allocation3], 4294965248 }
   0xa   :  { %238 = dma.done.wait [#allocation5], 2048  }
   0xb   :  { %239 = vsyncadd [#allocation5], 4294965248  ;;  %v69_v0 = vld [vmem:[#allocation2 + $0x78] sm:$0xff]  ;;  %v68_v1 = vld [vmem:[#allocation2 + $0x70] sm:$0xff] }
   0xc   :  { %150 = vmatpush.msra.mxu2 %v69_v0  ;;  %74 = vmatpush.msra.mxu0 %v69_v0  ;;  %v67_v2 = vld [vmem:[#allocation2 + $0x68] sm:$0xff]  ;;  %v66_v3 = vld [vmem:[#allocation2 + $0x60] sm:$0xff]  ;;  %v65_v4 = vld [vmem:[#allocation2 + $0x58] sm:$0xff] }
   0xd   :  { %v114_v5 = vld [vmem:[#allocation4 + $0x78] sm:$0xff]  ;;  %v113_v6 = vld [vmem:[#allocation4 + $0x70] sm:$0xff]  ;;  %v112_v8 = vld [vmem:[#allocation4 + $0x68] sm:$0xff] }
   0xe   :  { %151 = vmatpush.msra.mxu2 %v68_v1  ;;  %75 = vmatpush.msra.mxu0 %v68_v1  ;;  %v64_v7 = vld [vmem:[#allocation2 + $0x50] sm:$0xff]  ;;  %v63_v9 = vld [vmem:[#allocation2 + $0x48] sm:$0xff]  ;;  %v111_v10 = vld [vmem:[#allocation4 + $0x60] sm:$0xff] }
   0xf   :  { %166 = vmatpush.msra.mxu3 %v114_v5  ;;  %119 = vmatpush.msra.mxu1 %v114_v5  ;;  %v62_v11 = vld [vmem:[#allocation2 + $0x40] sm:$0xff]  ;;  %v110_v12 = vld [vmem:[#allocation4 + $0x58] sm:$0xff]  ;;  %v109_v14 = vld [vmem:[#allocation4 + $0x50] sm:$0xff] }
  0x10   :  { %152 = vmatpush.msra.mxu2 %v67_v2  ;;  %76 = vmatpush.msra.mxu0 %v67_v2  ;;  %v61_v13 = vld [vmem:[#allocation2 + $0x38] sm:$0xff]  ;;  %v60_v15 = vld [vmem:[#allocation2 + $0x30] sm:$0xff]  ;;  %v108_v16 = vld [vmem:[#allocation4 + $0x48] sm:$0xff] }
  0x11   :  { %167 = vmatpush.msra.mxu3 %v113_v6  ;;  %120 = vmatpush.msra.mxu1 %v113_v6  ;;  %v59_v17 = vld [vmem:[#allocation2 + $0x28] sm:$0xff]  ;;  %v107_v18 = vld [vmem:[#allocation4 + $0x40] sm:$0xff]  ;;  %v106_v20 = vld [vmem:[#allocation4 + $0x38] sm:$0xff] }
  0x12   :  { %153 = vmatpush.msra.mxu2 %v66_v3  ;;  %77 = vmatpush.msra.mxu0 %v66_v3  ;;  %v58_v19 = vld [vmem:[#allocation2 + $0x20] sm:$0xff]  ;;  %v57_v21 = vld [vmem:[#allocation2 + $0x18] sm:$0xff]  ;;  %v105_v22 = vld [vmem:[#allocation4 + $0x30] sm:$0xff] }
  0x13   :  { %168 = vmatpush.msra.mxu3 %v112_v8  ;;  %121 = vmatpush.msra.mxu1 %v112_v8  ;;  %v56_v23 = vld [vmem:[#allocation2 + $0x10] sm:$0xff]  ;;  %v104_v24 = vld [vmem:[#allocation4 + $0x28] sm:$0xff]  ;;  %v103_v26 = vld [vmem:[#allocation4 + $0x20] sm:$0xff] }
  0x14   :  { %154 = vmatpush.msra.mxu2 %v65_v4  ;;  %78 = vmatpush.msra.mxu0 %v65_v4  ;;  %v55_v25 = vld [vmem:[#allocation2 + $0x8] sm:$0xff]  ;;  %v54_v27 = vld [vmem:[#allocation2] sm:$0xff]  ;;  %v102_v30 = vld [vmem:[#allocation4 + $0x18] sm:$0xff] }
  0x15   :  { %169 = vmatpush.msra.mxu3 %v111_v10  ;;  %122 = vmatpush.msra.mxu1 %v111_v10  ;;  %v53_v28 = vld [vmem:[%s298_s0 + $0x8] sm:$0xff]  ;;  %v52_v29 = vld [vmem:[%s298_s0] sm:$0xff]  ;;  %v101_v31 = vld [vmem:[#allocation4 + $0x10] sm:$0xff] }
  0x16   :  { %155 = vmatpush.msra.mxu2 %v64_v7  ;;  %79 = vmatpush.msra.mxu0 %v64_v7  ;;  %v100_v32 = vld [vmem:[#allocation4 + $0x8] sm:$0xff]  ;;  %v99_v33 = vld [vmem:[#allocation4] sm:$0xff] }
  0x17   :  { %170 = vmatpush.msra.mxu3 %v110_v12  ;;  %123 = vmatpush.msra.mxu1 %v110_v12  ;;  %v186_v34 = vld [vmem:[%s300_s2] ss:$0 sm:$0xff] }
  0x18   :  { %156 = vmatpush.msra.mxu2 %v63_v9  ;;  %80 = vmatpush.msra.mxu0 %v63_v9  ;;  %v187_v41 = vld [vmem:[%s302_s4] ss:$0 sm:$0xff] }
  0x19   :  { %171 = vmatpush.msra.mxu3 %v109_v14  ;;  %124 = vmatpush.msra.mxu1 %v109_v14 }
  0x1a   :  { %157 = vmatpush.msra.mxu2 %v62_v11  ;;  %81 = vmatpush.msra.mxu0 %v62_v11 }
  0x1b   :  { %172 = vmatpush.msra.mxu3 %v108_v16  ;;  %125 = vmatpush.msra.mxu1 %v108_v16 }
  0x1c   :  { %158 = vmatpush.msra.mxu2 %v61_v13  ;;  %82 = vmatpush.msra.mxu0 %v61_v13 }
  0x1d   :  { %173 = vmatpush.msra.mxu3 %v107_v18  ;;  %126 = vmatpush.msra.mxu1 %v107_v18 }
  0x1e   :  { %159 = vmatpush.msra.mxu2 %v60_v15  ;;  %83 = vmatpush.msra.mxu0 %v60_v15 }
  0x1f   :  { %174 = vmatpush.msra.mxu3 %v106_v20  ;;  %127 = vmatpush.msra.mxu1 %v106_v20 }
  0x20   :  { %160 = vmatpush.msra.mxu2 %v59_v17  ;;  %84 = vmatpush.msra.mxu0 %v59_v17 }
  0x21   :  { %175 = vmatpush.msra.mxu3 %v105_v22  ;;  %128 = vmatpush.msra.mxu1 %v105_v22 }
  0x22   :  { %161 = vmatpush.msra.mxu2 %v58_v19  ;;  %85 = vmatpush.msra.mxu0 %v58_v19 }
  0x23   :  { %176 = vmatpush.msra.mxu3 %v104_v24  ;;  %129 = vmatpush.msra.mxu1 %v104_v24 }
  0x24   :  { %162 = vmatpush.msra.mxu2 %v57_v21  ;;  %86 = vmatpush.msra.mxu0 %v57_v21 }
  0x25   :  { %177 = vmatpush.msra.mxu3 %v103_v26  ;;  %130 = vmatpush.msra.mxu1 %v103_v26 }
  0x26   :  { %163 = vmatpush.msra.mxu2 %v56_v23  ;;  %87 = vmatpush.msra.mxu0 %v56_v23 }
  0x27   :  { %178 = vmatpush.msra.mxu3 %v102_v30  ;;  %131 = vmatpush.msra.mxu1 %v102_v30 }
  0x28   :  { %164 = vmatpush.msra.mxu2 %v55_v25  ;;  %88 = vmatpush.msra.mxu0 %v55_v25 }
  0x29   :  { %179 = vmatpush.msra.mxu3 %v101_v31  ;;  %132 = vmatpush.msra.mxu1 %v101_v31 }
  0x2a   :  { %165 = vmatpush.msra.mxu2 %v54_v27  ;;  %89 = vmatpush.msra.mxu0 %v54_v27 }
  0x2b   :  { %93 = vmatmul.f32.vlgmr.msra.gmra.mxu2 %v53_v28  ;;  %90 = vmatmul.f32.vlgmr.msra.gmra.mxu0 %v52_v29 }
  0x2c   :  { %180 = vmatpush.msra.mxu3 %v100_v32  ;;  %133 = vmatpush.msra.mxu1 %v100_v32 }
  0x2e   :  { %181 = vmatpush.msra.mxu3 %v99_v33  ;;  %134 = vmatpush.msra.mxu1 %v99_v33 }
  0xa8   :  { %v91_v35 = vpop.f32.mrf.mxu0 }
  0xa9   :  { %v92_v36 = vadd.f32 %v186_v34, %v91_v35 }
  0xab   :  { %v97_v37 = vmax.f32 %v92_v36, 0.0 }
  0xad   :  { %135 = vmatmul.f32.vlgmr.msra.gmra.mxu1 %v97_v37 }
  0xae   :  { %v94_v38 = vpop.f32.mrf.mxu2 }
  0xaf   :  { %v95_v39 = vadd.f32 %v186_v34, %v94_v38 }
  0xb1   :  { %v98_v40 = vmax.f32 %v95_v39, 0.0 }
  0xb3   :  { %138 = vmatmul.f32.vlgmr.msra.gmra.mxu3 %v98_v40 }
 0x12a   :  { %v136_v42 = vpop.f32.mrf.mxu1 }
 0x12b   :  { %v137_v43 = vadd.f32 %v187_v41, %v136_v42 }
 0x12d   :  { %142 = vst [vmem:[%s303_s5] sm:$0xff] %v137_v43 }
 0x136   :  { %v139_v44 = vpop.f32.mrf.mxu3 }
 0x137   :  { %v140_v45 = vadd.f32 %v187_v41, %v139_v44 }
 0x139   :  { %143 = vst [vmem:[%s303_s5 + $0x8] sm:$0xff] %v140_v45 }
 0x13a   :  { %148 = vsyncpa [#allocation3], 1 }
 0x13b   :  { %149 = vsyncpa [#allocation5], 1 }

</bundles_post_ra>
